<compile_context>
chip_gen: v7x
topology: tpu7x:2x2x1
jax: 0.10.0
libtpu: 0.0.40
codegen_flags: <defaults>
</compile_context>

<pallas_src>
import functools

import jax
import jax.numpy as jnp
from jax.experimental import pallas as pl
from jax.experimental.pallas import tpu as pltpu

_HAS_KERNEL_PRNG = (
    hasattr(pltpu, "prng_seed")
    and hasattr(pltpu, "prng_random_bits")
    and hasattr(pltpu, "stateful_normal")
)

# Tri-state module-level capability cache: None = not probed yet,
# True = in-kernel PRNG path compiles & runs, False = use fallback forever.
_PRNG_SUPPORTED = None


# ----------------------------------------------------------------------------
# Kernels
# ----------------------------------------------------------------------------
def _root_kernel_prng(seed_ref, ctx_ref, z_ref, mask_ref, n_ref, *, max_n, cdim):
    """Single-step kernel: N and noise drawn from the on-chip PRNG.

    seed_ref : (1,)   int32  SMEM (scalar prefetch)
    ctx_ref  : (B, L) f32    pre-tiled fixed context, L = max_N * C
    z_ref    : (2B,L) f32    output Z = [noise ; tiled context]
    mask_ref : (2B,L) f32    output node-masked Z
    n_ref    : (B, 1) int32  output sampled node counts
    """
    b = ctx_ref.shape[0]
    l = z_ref.shape[-1]

    pltpu.prng_seed(seed_ref[0])

    # N ~ Uniform{1..max_N}: low log2(max_N) bits of a random word (+1).
    # Unbiased because max_N is a power of two.
    bits = pltpu.prng_random_bits((b, 1))
    n = jnp.bitwise_and(bits, max_n - 1).astype(jnp.int32) + 1        # (B, 1)
    n_ref[...] = n

    noise = pltpu.stateful_normal((b, l), jnp.float32)                # (B, L)
    ctx = ctx_ref[...]                                                # (B, L)

    # keep node n_idx = lane // C  iff  n_idx < N[b]  <=>  lane < N[b] * C.
    lane = jax.lax.broadcasted_iota(jnp.int32, (b, l), 1)
    keep = lane < n * cdim                                            # (B, L)

    # Direct slice stores: no sublane-axis concatenates, single (B,L) mask.
    z_ref[pl.ds(0, b), :] = noise
    z_ref[pl.ds(b, b), :] = ctx
    mask_ref[pl.ds(0, b), :] = jnp.where(keep, noise, 0.0)
    mask_ref[pl.ds(b, b), :] = jnp.where(keep, ctx, 0.0)


def _root_kernel_ext(n_ref, noise_ref, ctx_ref, z_ref, mask_ref, *, cdim):
    """Fallback kernel: N via scalar prefetch (SMEM), noise supplied from HBM.

    n_ref     : (B,)   int32  SMEM (scalar prefetch)
    noise_ref : (B, L) f32
    ctx_ref   : (B, L) f32    pre-tiled fixed context
    z_ref     : (2B,L) f32
    mask_ref  : (2B,L) f32
    """
    b, l = noise_ref.shape

    lane = jax.lax.broadcasted_iota(jnp.int32, (b, l), 1)
    row = jax.lax.broadcasted_iota(jnp.int32, (b, l), 0)
    # Per-row threshold N[b]*C from scalar SMEM reads (B is small & static).
    thr = jnp.zeros((b, l), jnp.int32)
    for bb in range(b):
        thr = jnp.where(row == bb, n_ref[bb] * cdim, thr)
    keep = lane < thr

    noise = noise_ref[...]
    ctx = ctx_ref[...]

    z_ref[pl.ds(0, b), :] = noise
    z_ref[pl.ds(b, b), :] = ctx
    mask_ref[pl.ds(0, b), :] = jnp.where(keep, noise, 0.0)
    mask_ref[pl.ds(b, b), :] = jnp.where(keep, ctx, 0.0)
    # TODO(synk): on builds where only stateful_normal fails, a Box-Muller draw
    # from prng_random_bits could replace the HBM noise input here.


# ----------------------------------------------------------------------------
# pallas_call wrappers
# ----------------------------------------------------------------------------
@functools.partial(jax.jit, static_argnames=("max_n", "context_dim"))
def _run_root_prng(seed, ctx_tiled, *, max_n, context_dim):
    b, l = ctx_tiled.shape
    out2d = jax.ShapeDtypeStruct((2 * b, l), jnp.float32)
    n_out = jax.ShapeDtypeStruct((b, 1), jnp.int32)
    full = lambda i, seed_ref: (0, 0)   # one block covering each whole array

    z2d, m2d, n2d = pl.pallas_call(
        functools.partial(_root_kernel_prng, max_n=max_n, cdim=context_dim),
        out_shape=(out2d, out2d, n_out),
        grid_spec=pltpu.PrefetchScalarGridSpec(
            num_scalar_prefetch=1,          # seed -> SMEM
            grid=(1,),                      # single invocation, no pipeline
            in_specs=[
                pl.BlockSpec((b, l), full),         # pre-tiled context (lane-dense)
            ],
            out_specs=[
                pl.BlockSpec((2 * b, l), full),     # Z
                pl.BlockSpec((2 * b, l), full),     # masked Z
                pl.BlockSpec((b, 1), full),         # N
            ],
        ),
        compiler_params=pltpu.CompilerParams(
            dimension_semantics=("arbitrary",)),
        cost_estimate=pl.CostEstimate(
            flops=8 * 2 * b * l,
            transcendentals=b * l,
            bytes_accessed=(b * l + 2 * (2 * b * l) + b) * 4),
    )(seed, ctx_tiled)

    shp = (2 * b, max_n, context_dim)
    return m2d.reshape(shp), z2d.reshape(shp), n2d.reshape(b)


@functools.partial(jax.jit, static_argnames=("max_n", "context_dim"))
def _run_root_ext(n, noise2d, ctx_tiled, *, max_n, context_dim):
    b, l = noise2d.shape
    out2d = jax.ShapeDtypeStruct((2 * b, l), jnp.float32)
    full = lambda i, n_ref: (0, 0)

    z2d, m2d = pl.pallas_call(
        functools.partial(_root_kernel_ext, cdim=context_dim),
        out_shape=(out2d, out2d),
        grid_spec=pltpu.PrefetchScalarGridSpec(
            num_scalar_prefetch=1,          # N -> SMEM
            grid=(1,),
            in_specs=[
                pl.BlockSpec((b, l), full),         # noise (lane-dense)
                pl.BlockSpec((b, l), full),         # pre-tiled context
            ],
            out_specs=[
                pl.BlockSpec((2 * b, l), full),
                pl.BlockSpec((2 * b, l), full),
            ],
        ),
        compiler_params=pltpu.CompilerParams(
            dimension_semantics=("arbitrary",)),
        cost_estimate=pl.CostEstimate(
            flops=8 * 2 * b * l,
            transcendentals=0,
            bytes_accessed=(2 * b * l + 2 * (2 * b * l) + b) * 4),
    )(n.astype(jnp.int32), noise2d, ctx_tiled)

    shp = (2 * b, max_n, context_dim)
    return m2d.reshape(shp), z2d.reshape(shp)


# ----------------------------------------------------------------------------
# Module wrapper
# ----------------------------------------------------------------------------
class FixedContextRootPallas:
    """JAX/Pallas re-implementation of FixedContextRoot (forward only)."""

    def __init__(self, max_n=16, node_embedding_dim=32, context_dim=32,
                 embedding_batch_size=2, allow_greater=False, key=None):
        self.max_N = max_n
        self.node_embedding_dim = node_embedding_dim
        self.context_dim = context_dim
        self.embedding_batch_size = embedding_batch_size
        self.allow_greater = allow_greater
        if key is None:
            key = jax.random.PRNGKey(0)
        k_ctx, k_seed, self._k_rest = jax.random.split(key, 3)

        # fixed_context ~ Normal(0,1), shape [embedding_batch_size, 1, context_dim]
        # (a trainable nn.Parameter upstream; forward-only constant here)
        self.fixed_context = jax.random.normal(
            k_ctx, (embedding_batch_size, 1, context_dim), dtype=jnp.float32)

        # Pre-tiled, lane-dense (EB, max_N*C) context: built once, reused every call.
        self._ctx_tiled_full = jnp.tile(self.fixed_context[:, 0, :], (1, max_n))
        self._ctx_cache = {}

        # Host-side seed stream for the hardware PRNG (no per-call RNG dispatch).
        self._seed_base = int(jax.random.randint(k_seed, (), 0, 2 ** 31 - 1))
        self._call_count = 0
        self._max_n_pow2 = (max_n & (max_n - 1)) == 0 and max_n > 0

    def _ctx_tiled(self, batch_size):
        ctx = self._ctx_cache.get(batch_size)
        if ctx is None:
            ctx = self._ctx_tiled_full[:batch_size]
            self._ctx_cache[batch_size] = ctx
        return ctx

    def forward(self, batch_size, Z=None, N=None):
        global _PRNG_SUPPORTED

        if Z is not None:
            # TODO(synk): external-Z path (mask a caller-provided Z) not implemented.
            raise NotImplementedError("external Z path not implemented")

        if batch_size > self.embedding_batch_size:
            if not self.allow_greater:
                raise ValueError(
                    f"Requested batch size {batch_size} with fixed embedding size "
                    f"{self.embedding_batch_size} and no expansion allowed")
            # TODO(synk): upstream `.expand` in the allow_greater branch is a no-op
            # (result not assigned); branch not exercised here.

        ctx_tiled = self._ctx_tiled(batch_size)
        self._call_count += 1

        use_prng = (N is None and self._max_n_pow2 and _HAS_KERNEL_PRNG
                    and _PRNG_SUPPORTED is not False)
        if use_prng:
            seed = (self._seed_base + self._call_count * 2654435761) & 0x7FFFFFFF
            seed_arr = jnp.asarray([seed], dtype=jnp.int32)
            if _PRNG_SUPPORTED:
                masked, Zfull, Nout = _run_root_prng(
                    seed_arr, ctx_tiled,
                    max_n=self.max_N, context_dim=self.context_dim)
                return masked, None, Nout, Zfull
            # One-time capability probe (first call only); result cached globally.
            try:
                masked, Zfull, Nout = _run_root_prng(
                    seed_arr, ctx_tiled,
                    max_n=self.max_N, context_dim=self.context_dim)
                jax.block_until_ready((masked, Zfull, Nout))
                _PRNG_SUPPORTED = True
                return masked, None, Nout, Zfull
            except Exception:
                _PRNG_SUPPORTED = False   # probe failed: use fallback from now on

        # -------- fallback / external-N path (host-side RNG) --------
        k_n, k_noise, self._k_rest = jax.random.split(self._k_rest, 3)
        if N is None:
            logits = jnp.zeros((self.max_N,), dtype=jnp.float32)
            N = jax.random.categorical(
                k_n, logits, shape=(batch_size,)).astype(jnp.int32) + 1
        else:
            N = jnp.asarray(N, dtype=jnp.int32)

        noise = jax.random.normal(
            k_noise, (batch_size, self.max_N * self.context_dim), dtype=jnp.float32)
        masked, Zfull = _run_root_ext(
            N, noise, ctx_tiled, max_n=self.max_N, context_dim=self.context_dim)
        return masked, None, N, Zfull


if __name__ == "__main__":
    key = jax.random.PRNGKey(0)
    batch_size = 2
    max_n = 16
    context_dim = 32

    root = FixedContextRootPallas(
        max_n=max_n, context_dim=context_dim,
        embedding_batch_size=batch_size, key=key)

    masked, _, N, Z = root.forward(batch_size)
    jax.block_until_ready((masked, N, Z))

    # --- lightweight correctness checks against a pure-JAX reference ---
    assert Z.shape == (2 * batch_size, max_n, context_dim)
    assert masked.shape == (2 * batch_size, max_n, context_dim)
    assert N.shape == (batch_size,)
    assert bool(jnp.all((N >= 1) & (N <= max_n)))

    # context half of Z must equal the broadcast fixed context
    ctx_full = jnp.broadcast_to(root.fixed_context[:batch_size],
                                (batch_size, max_n, context_dim))
    assert jnp.allclose(Z[batch_size:], ctx_full, atol=1e-6)

    # masking: rows with node index >= N[b] are zeroed, same N for both halves
    node_ids = jnp.arange(max_n)[None, :, None]
    mask = (node_ids < N[:, None, None]).astype(jnp.float32)
    ref_masked = jnp.concatenate(
        [Z[:batch_size] * mask, Z[batch_size:] * mask], axis=0)
    assert jnp.allclose(masked, ref_masked, atol=1e-6)

    # loose sanity on the Normal(0,1) noise half (generous, ~>10 sigma bounds)
    noise_half = Z[:batch_size]
    assert abs(float(noise_half.mean())) < 0.35
    assert 0.5 < float(noise_half.std()) < 1.5

    # run a second forward to exercise the cached (post-probe) fast path
    masked2, _, N2, Z2 = root.forward(batch_size)
    jax.block_until_ready((masked2, N2, Z2))
    assert Z2.shape == Z.shape and bool(jnp.all((N2 >= 1) & (N2 <= max_n)))

    print("KERNEL_OK")
</pallas_src>

<mosaic_0001>
module attributes {stable_mosaic.version = 11 : i64} {
  func.func @_root_kernel_prng(%arg0: i32, %arg1: memref<1xi32, #tpu.memory_space<smem>>, %arg2: memref<2x512xf32, #tpu.memory_space<vmem>>, %arg3: memref<4x512xf32, #tpu.memory_space<vmem>>, %arg4: memref<4x512xf32, #tpu.memory_space<vmem>>, %arg5: memref<2x1xi32, #tpu.memory_space<vmem>>) attributes {dimension_semantics = [#tpu.dimension_semantics<arbitrary>], iteration_bounds = array<i64: 1>, scalar_prefetch = 1 : i64, scratch_operands = 0 : i64, tpu.core_type = #tpu.core_type<tc>, window_params = [{pipeline_mode = #tpu.pipeline_mode<synchronous>, transform_indices = @transform_0, window_bounds = array<i64: 2, 512>}, {pipeline_mode = #tpu.pipeline_mode<synchronous>, transform_indices = @transform_1, window_bounds = array<i64: 4, 512>}, {pipeline_mode = #tpu.pipeline_mode<synchronous>, transform_indices = @transform_2, window_bounds = array<i64: 4, 512>}, {pipeline_mode = #tpu.pipeline_mode<synchronous>, transform_indices = @transform_3, window_bounds = array<i64: 2, 1>}]} {
    %c0 = arith.constant 0 : index
    %0 = memref.load %arg1[%c0] : memref<1xi32, #tpu.memory_space<smem>>
    "tpu.prng_set_seed_32"(%0) : (i32) -> ()
    %1 = "tpu.prng_random_bits"() : () -> vector<2x1xi32>
    %c15_i32 = arith.constant 15 : i32
    %2 = vector.broadcast %c15_i32 : i32 to vector<2x1xi32>
    %3 = arith.andi %1, %2 : vector<2x1xi32>
    %c1_i32 = arith.constant 1 : i32
    %4 = vector.broadcast %c1_i32 : i32 to vector<2x1xi32>
    %5 = arith.addi %3, %4 : vector<2x1xi32>
    %c0_0 = arith.constant 0 : index
    %c0_1 = arith.constant 0 : index
    %6 = vector.load %arg5[%c0_0, %c0_1] : memref<2x1xi32, #tpu.memory_space<vmem>>, vector<2x1xi32>
    tpu.vector_store %arg5[%c0_0, %c0_1], %5 {strides = array<i32>} : memref<2x1xi32, #tpu.memory_space<vmem>>, vector<2x1xi32>,
    %c0_i32 = arith.constant 0 : i32
    %c0_i32_2 = arith.constant 0 : i32
    %cst = arith.constant -0.99999994 : f32
    %cst_3 = arith.constant 1.000000e+00 : f32
    %7 = vector.broadcast %cst : f32 to vector<1x1xf32>
    %8 = vector.broadcast %cst_3 : f32 to vector<1x1xf32>
    %9 = "tpu.prng_random_bits"() : () -> vector<2x512xi32>
    %c9_i32 = arith.constant 9 : i32
    %10 = vector.broadcast %c9_i32 : i32 to vector<2x512xi32>
    %11 = arith.shrui %9, %10 : vector<2x512xi32>
    %c1065353216_i32 = arith.constant 1065353216 : i32
    %12 = vector.broadcast %c1065353216_i32 : i32 to vector<2x512xi32>
    %13 = arith.ori %11, %12 : vector<2x512xi32>
    %14 = tpu.bitcast %13 : vector<2x512xi32> -> vector<2x512xf32>
    %cst_4 = arith.constant 1.000000e+00 : f32
    %15 = vector.broadcast %cst_4 : f32 to vector<2x512xf32>
    %16 = arith.subf %14, %15 : vector<2x512xf32>
    %17 = arith.subf %8, %7 : vector<1x1xf32>
    %18 = vector.broadcast %17 : vector<1x1xf32> to vector<2x512xf32>
    %19 = arith.mulf %16, %18 : vector<2x512xf32>
    %20 = vector.broadcast %7 : vector<1x1xf32> to vector<2x512xf32>
    %21 = arith.addf %19, %20 : vector<2x512xf32>
    %22 = vector.broadcast %7 : vector<1x1xf32> to vector<2x512xf32>
    %23 = arith.maximumf %22, %21 : vector<2x512xf32>
    %cst_5 = arith.constant 0.000000e+00 : f32
    %24 = vector.broadcast %cst_5 : f32 to vector<2x512xf32>
    %25 = arith.subf %24, %23 : vector<2x512xf32>
    %26 = arith.mulf %23, %25 : vector<2x512xf32>
    %27 = math.log1p %26 : vector<2x512xf32>
    %cst_6 = arith.constant 0.000000e+00 : f32
    %28 = vector.broadcast %cst_6 : f32 to vector<2x512xf32>
    %29 = arith.subf %28, %27 : vector<2x512xf32>
    %cst_7 = arith.constant 5.000000e+00 : f32
    %30 = vector.broadcast %cst_7 : f32 to vector<2x512xf32>
    %31 = arith.cmpf olt, %29, %30 : vector<2x512xf32>
    %cst_8 = arith.constant 2.500000e+00 : f32
    %32 = vector.broadcast %cst_8 : f32 to vector<2x512xf32>
    %33 = arith.subf %29, %32 : vector<2x512xf32>
    %34 = math.sqrt %29 : vector<2x512xf32>
    %cst_9 = arith.constant 3.000000e+00 : f32
    %35 = vector.broadcast %cst_9 : f32 to vector<2x512xf32>
    %36 = arith.subf %34, %35 : vector<2x512xf32>
    %37 = arith.select %31, %33, %36 : vector<2x512xi1>, vector<2x512xf32>
    %cst_10 = arith.constant 2.81022636E-8 : f32
    %cst_11 = arith.constant -2.00214257E-4 : f32
    %38 = vector.broadcast %cst_10 : f32 to vector<2x512xf32>
    %39 = vector.broadcast %cst_11 : f32 to vector<2x512xf32>
    %40 = arith.select %31, %38, %39 : vector<2x512xi1>, vector<2x512xf32>
    %cst_12 = arith.constant 3.43273939E-7 : f32
    %cst_13 = arith.constant 1.00950558E-4 : f32
    %41 = vector.broadcast %cst_12 : f32 to vector<2x512xf32>
    %42 = vector.broadcast %cst_13 : f32 to vector<2x512xf32>
    %43 = arith.select %31, %41, %42 : vector<2x512xi1>, vector<2x512xf32>
    %44 = arith.mulf %40, %37 : vector<2x512xf32>
    %45 = arith.addf %43, %44 : vector<2x512xf32>
    %cst_14 = arith.constant -3.5233877E-6 : f32
    %cst_15 = arith.constant 0.00134934322 : f32
    %46 = vector.broadcast %cst_14 : f32 to vector<2x512xf32>
    %47 = vector.broadcast %cst_15 : f32 to vector<2x512xf32>
    %48 = arith.select %31, %46, %47 : vector<2x512xi1>, vector<2x512xf32>
    %49 = arith.mulf %45, %37 : vector<2x512xf32>
    %50 = arith.addf %48, %49 : vector<2x512xf32>
    %cst_16 = arith.constant -4.39150654E-6 : f32
    %cst_17 = arith.constant -0.00367342844 : f32
    %51 = vector.broadcast %cst_16 : f32 to vector<2x512xf32>
    %52 = vector.broadcast %cst_17 : f32 to vector<2x512xf32>
    %53 = arith.select %31, %51, %52 : vector<2x512xi1>, vector<2x512xf32>
    %54 = arith.mulf %50, %37 : vector<2x512xf32>
    %55 = arith.addf %53, %54 : vector<2x512xf32>
    %cst_18 = arith.constant 2.1858087E-4 : f32
    %cst_19 = arith.constant 0.00573950773 : f32
    %56 = vector.broadcast %cst_18 : f32 to vector<2x512xf32>
    %57 = vector.broadcast %cst_19 : f32 to vector<2x512xf32>
    %58 = arith.select %31, %56, %57 : vector<2x512xi1>, vector<2x512xf32>
    %59 = arith.mulf %55, %37 : vector<2x512xf32>
    %60 = arith.addf %58, %59 : vector<2x512xf32>
    %cst_20 = arith.constant -0.00125372503 : f32
    %cst_21 = arith.constant -0.0076224613 : f32
    %61 = vector.broadcast %cst_20 : f32 to vector<2x512xf32>
    %62 = vector.broadcast %cst_21 : f32 to vector<2x512xf32>
    %63 = arith.select %31, %61, %62 : vector<2x512xi1>, vector<2x512xf32>
    %64 = arith.mulf %60, %37 : vector<2x512xf32>
    %65 = arith.addf %63, %64 : vector<2x512xf32>
    %cst_22 = arith.constant -0.00417768164 : f32
    %cst_23 = arith.constant 0.00943887047 : f32
    %66 = vector.broadcast %cst_22 : f32 to vector<2x512xf32>
    %67 = vector.broadcast %cst_23 : f32 to vector<2x512xf32>
    %68 = arith.select %31, %66, %67 : vector<2x512xi1>, vector<2x512xf32>
    %69 = arith.mulf %65, %37 : vector<2x512xf32>
    %70 = arith.addf %68, %69 : vector<2x512xf32>
    %cst_24 = arith.constant 0.246640727 : f32
    %cst_25 = arith.constant 1.00167406 : f32
    %71 = vector.broadcast %cst_24 : f32 to vector<2x512xf32>
    %72 = vector.broadcast %cst_25 : f32 to vector<2x512xf32>
    %73 = arith.select %31, %71, %72 : vector<2x512xi1>, vector<2x512xf32>
    %74 = arith.mulf %70, %37 : vector<2x512xf32>
    %75 = arith.addf %73, %74 : vector<2x512xf32>
    %cst_26 = arith.constant 1.50140941 : f32
    %cst_27 = arith.constant 2.83297682 : f32
    %76 = vector.broadcast %cst_26 : f32 to vector<2x512xf32>
    %77 = vector.broadcast %cst_27 : f32 to vector<2x512xf32>
    %78 = arith.select %31, %76, %77 : vector<2x512xi1>, vector<2x512xf32>
    %79 = arith.mulf %75, %37 : vector<2x512xf32>
    %80 = arith.addf %78, %79 : vector<2x512xf32>
    %81 = math.absf %23 : vector<2x512xf32>
    %cst_28 = arith.constant 1.000000e+00 : f32
    %82 = vector.broadcast %cst_28 : f32 to vector<2x512xf32>
    %83 = arith.cmpf oeq, %81, %82 : vector<2x512xf32>
    %cst_29 = arith.constant 0x7F800000 : f32
    %84 = vector.broadcast %cst_29 : f32 to vector<2x512xf32>
    %85 = arith.mulf %84, %23 : vector<2x512xf32>
    %86 = arith.mulf %80, %23 : vector<2x512xf32>
    %87 = arith.select %83, %85, %86 : vector<2x512xi1>, vector<2x512xf32>
    %cst_30 = arith.constant 1.41421354 : f32
    %88 = vector.broadcast %cst_30 : f32 to vector<2x512xf32>
    %89 = arith.mulf %88, %87 : vector<2x512xf32>
    %c0_31 = arith.constant 0 : index
    %c0_32 = arith.constant 0 : index
    %90 = vector.load %arg2[%c0_31, %c0_32] : memref<2x512xf32, #tpu.memory_space<vmem>>, vector<2x512xf32>
    %91 = tpu.iota {dimensions = array<i32: 1>} : vector<2x512xi32>
    %c32_i32 = arith.constant 32 : i32
    %92 = vector.broadcast %c32_i32 : i32 to vector<2x1xi32>
    %93 = arith.muli %5, %92 : vector<2x1xi32>
    %94 = vector.broadcast %93 : vector<2x1xi32> to vector<2x512xi32>
    %95 = arith.cmpi slt, %91, %94 : vector<2x512xi32>
    %c0_33 = arith.constant 0 : index
    %c0_34 = arith.constant 0 : index
    %96 = vector.load %arg3[%c0_33, %c0_34] : memref<4x512xf32, #tpu.memory_space<vmem>>, vector<2x512xf32>
    tpu.vector_store %arg3[%c0_33, %c0_34], %89 {strides = array<i32>} : memref<4x512xf32, #tpu.memory_space<vmem>>, vector<2x512xf32>,
    %c2 = arith.constant 2 : index
    %c0_35 = arith.constant 0 : index
    %97 = vector.load %arg3[%c2, %c0_35] : memref<4x512xf32, #tpu.memory_space<vmem>>, vector<2x512xf32>
    tpu.vector_store %arg3[%c2, %c0_35], %90 {strides = array<i32>} : memref<4x512xf32, #tpu.memory_space<vmem>>, vector<2x512xf32>,
    %cst_36 = arith.constant 0.000000e+00 : f32
    %98 = vector.broadcast %cst_36 : f32 to vector<2x512xf32>
    %99 = arith.select %95, %89, %98 : vector<2x512xi1>, vector<2x512xf32>
    %c0_37 = arith.constant 0 : index
    %c0_38 = arith.constant 0 : index
    %100 = vector.load %arg4[%c0_37, %c0_38] : memref<4x512xf32, #tpu.memory_space<vmem>>, vector<2x512xf32>
    tpu.vector_store %arg4[%c0_37, %c0_38], %99 {strides = array<i32>} : memref<4x512xf32, #tpu.memory_space<vmem>>, vector<2x512xf32>,
    %cst_39 = arith.constant 0.000000e+00 : f32
    %101 = vector.broadcast %cst_39 : f32 to vector<2x512xf32>
    %102 = arith.select %95, %90, %101 : vector<2x512xi1>, vector<2x512xf32>
    %c2_40 = arith.constant 2 : index
    %c0_41 = arith.constant 0 : index
    %103 = vector.load %arg4[%c2_40, %c0_41] : memref<4x512xf32, #tpu.memory_space<vmem>>, vector<2x512xf32>
    tpu.vector_store %arg4[%c2_40, %c0_41], %102 {strides = array<i32>} : memref<4x512xf32, #tpu.memory_space<vmem>>, vector<2x512xf32>,
    return
  }
  func.func @transform_0(%arg0: i32, %arg1: memref<1xi32, #tpu.memory_space<smem>>) -> (i32, i32) {
    %c0_i32 = arith.constant 0 : i32
    %c0_i32_0 = arith.constant 0 : i32
    %c0_i32_1 = arith.constant 0 : i32
    return %c0_i32, %c0_i32_0 : i32, i32
  }
  func.func @transform_1(%arg0: i32, %arg1: memref<1xi32, #tpu.memory_space<smem>>) -> (i32, i32) {
    %c0_i32 = arith.constant 0 : i32
    %c0_i32_0 = arith.constant 0 : i32
    %c0_i32_1 = arith.constant 0 : i32
    return %c0_i32, %c0_i32_0 : i32, i32
  }
  func.func @transform_2(%arg0: i32, %arg1: memref<1xi32, #tpu.memory_space<smem>>) -> (i32, i32) {
    %c0_i32 = arith.constant 0 : i32
    %c0_i32_0 = arith.constant 0 : i32
    %c0_i32_1 = arith.constant 0 : i32
    return %c0_i32, %c0_i32_0 : i32, i32
  }
  func.func @transform_3(%arg0: i32, %arg1: memref<1xi32, #tpu.memory_space<smem>>) -> (i32, i32) {
    %c0_i32 = arith.constant 0 : i32
    %c0_i32_0 = arith.constant 0 : i32
    %c0_i32_1 = arith.constant 0 : i32
    return %c0_i32, %c0_i32_0 : i32, i32
  }
}

module attributes {stable_mosaic.version = 11 : i64} {
  func.func @_root_kernel_ext(%arg0: i32, %arg1: memref<2xi32, #tpu.memory_space<smem>>, %arg2: memref<2x512xf32, #tpu.memory_space<vmem>>, %arg3: memref<2x512xf32, #tpu.memory_space<vmem>>, %arg4: memref<4x512xf32, #tpu.memory_space<vmem>>, %arg5: memref<4x512xf32, #tpu.memory_space<vmem>>) attributes {dimension_semantics = [#tpu.dimension_semantics<arbitrary>], iteration_bounds = array<i64: 1>, scalar_prefetch = 1 : i64, scratch_operands = 0 : i64, tpu.core_type = #tpu.core_type<tc>, window_params = [{pipeline_mode = #tpu.pipeline_mode<synchronous>, transform_indices = @transform_0, window_bounds = array<i64: 2, 512>}, {pipeline_mode = #tpu.pipeline_mode<synchronous>, transform_indices = @transform_1, window_bounds = array<i64: 2, 512>}, {pipeline_mode = #tpu.pipeline_mode<synchronous>, transform_indices = @transform_2, window_bounds = array<i64: 4, 512>}, {pipeline_mode = #tpu.pipeline_mode<synchronous>, transform_indices = @transform_3, window_bounds = array<i64: 4, 512>}]} {
    %0 = tpu.iota {dimensions = array<i32: 1>} : vector<2x512xi32>
    %1 = tpu.iota {dimensions = array<i32: 0>} : vector<2x512xi32>
    %c0_i32 = arith.constant 0 : i32
    %2 = vector.broadcast %c0_i32 : i32 to vector<2x512xi32>
    %c0_i32_0 = arith.constant 0 : i32
    %3 = vector.broadcast %c0_i32_0 : i32 to vector<2x512xi32>
    %4 = arith.cmpi eq, %1, %3 : vector<2x512xi32>
    %c0 = arith.constant 0 : index
    %5 = memref.load %arg1[%c0] : memref<2xi32, #tpu.memory_space<smem>>
    %c32_i32 = arith.constant 32 : i32
    %6 = arith.muli %5, %c32_i32 : i32
    %7 = vector.broadcast %6 : i32 to vector<2x512xi32>
    %8 = arith.select %4, %7, %2 : vector<2x512xi1>, vector<2x512xi32>
    %c1_i32 = arith.constant 1 : i32
    %9 = vector.broadcast %c1_i32 : i32 to vector<2x512xi32>
    %10 = arith.cmpi eq, %1, %9 : vector<2x512xi32>
    %c1 = arith.constant 1 : index
    %11 = memref.load %arg1[%c1] : memref<2xi32, #tpu.memory_space<smem>>
    %c32_i32_1 = arith.constant 32 : i32
    %12 = arith.muli %11, %c32_i32_1 : i32
    %13 = vector.broadcast %12 : i32 to vector<2x512xi32>
    %14 = arith.select %10, %13, %8 : vector<2x512xi1>, vector<2x512xi32>
    %15 = arith.cmpi slt, %0, %14 : vector<2x512xi32>
    %c0_2 = arith.constant 0 : index
    %c0_3 = arith.constant 0 : index
    %16 = vector.load %arg2[%c0_2, %c0_3] : memref<2x512xf32, #tpu.memory_space<vmem>>, vector<2x512xf32>
    %c0_4 = arith.constant 0 : index
    %c0_5 = arith.constant 0 : index
    %17 = vector.load %arg3[%c0_4, %c0_5] : memref<2x512xf32, #tpu.memory_space<vmem>>, vector<2x512xf32>
    %c0_6 = arith.constant 0 : index
    %c0_7 = arith.constant 0 : index
    %18 = vector.load %arg4[%c0_6, %c0_7] : memref<4x512xf32, #tpu.memory_space<vmem>>, vector<2x512xf32>
    tpu.vector_store %arg4[%c0_6, %c0_7], %16 {strides = array<i32>} : memref<4x512xf32, #tpu.memory_space<vmem>>, vector<2x512xf32>,
    %c2 = arith.constant 2 : index
    %c0_8 = arith.constant 0 : index
    %19 = vector.load %arg4[%c2, %c0_8] : memref<4x512xf32, #tpu.memory_space<vmem>>, vector<2x512xf32>
    tpu.vector_store %arg4[%c2, %c0_8], %17 {strides = array<i32>} : memref<4x512xf32, #tpu.memory_space<vmem>>, vector<2x512xf32>,
    %cst = arith.constant 0.000000e+00 : f32
    %20 = vector.broadcast %cst : f32 to vector<2x512xf32>
    %21 = arith.select %15, %16, %20 : vector<2x512xi1>, vector<2x512xf32>
    %c0_9 = arith.constant 0 : index
    %c0_10 = arith.constant 0 : index
    %22 = vector.load %arg5[%c0_9, %c0_10] : memref<4x512xf32, #tpu.memory_space<vmem>>, vector<2x512xf32>
    tpu.vector_store %arg5[%c0_9, %c0_10], %21 {strides = array<i32>} : memref<4x512xf32, #tpu.memory_space<vmem>>, vector<2x512xf32>,
    %cst_11 = arith.constant 0.000000e+00 : f32
    %23 = vector.broadcast %cst_11 : f32 to vector<2x512xf32>
    %24 = arith.select %15, %17, %23 : vector<2x512xi1>, vector<2x512xf32>
    %c2_12 = arith.constant 2 : index
    %c0_13 = arith.constant 0 : index
    %25 = vector.load %arg5[%c2_12, %c0_13] : memref<4x512xf32, #tpu.memory_space<vmem>>, vector<2x512xf32>
    tpu.vector_store %arg5[%c2_12, %c0_13], %24 {strides = array<i32>} : memref<4x512xf32, #tpu.memory_space<vmem>>, vector<2x512xf32>,
    return
  }
  func.func @transform_0(%arg0: i32, %arg1: memref<2xi32, #tpu.memory_space<smem>>) -> (i32, i32) {
    %c0_i32 = arith.constant 0 : i32
    %c0_i32_0 = arith.constant 0 : i32
    %c0_i32_1 = arith.constant 0 : i32
    return %c0_i32, %c0_i32_0 : i32, i32
  }
  func.func @transform_1(%arg0: i32, %arg1: memref<2xi32, #tpu.memory_space<smem>>) -> (i32, i32) {
    %c0_i32 = arith.constant 0 : i32
    %c0_i32_0 = arith.constant 0 : i32
    %c0_i32_1 = arith.constant 0 : i32
    return %c0_i32, %c0_i32_0 : i32, i32
  }
  func.func @transform_2(%arg0: i32, %arg1: memref<2xi32, #tpu.memory_space<smem>>) -> (i32, i32) {
    %c0_i32 = arith.constant 0 : i32
    %c0_i32_0 = arith.constant 0 : i32
    %c0_i32_1 = arith.constant 0 : i32
    return %c0_i32, %c0_i32_0 : i32, i32
  }
  func.func @transform_3(%arg0: i32, %arg1: memref<2xi32, #tpu.memory_space<smem>>) -> (i32, i32) {
    %c0_i32 = arith.constant 0 : i32
    %c0_i32_0 = arith.constant 0 : i32
    %c0_i32_1 = arith.constant 0 : i32
    return %c0_i32, %c0_i32_0 : i32, i32
  }
}

</mosaic_0001>

<bundles_post_ra>
// kernel: _run_root_prng.1
= control target key start
LH: loop header
LB: loop body
LE: loop exit
PB: predicated region body
PF: predicated region fallthrough
CT: control target
= control target key end

     0   :  { %11 = vsyncpa [#allocation5], 0  ;;  %s569_s15 = smov [#allocation4]   ;;  %s874_s0 = inlined_call_operand.<no memory space> [shape: s32[1], index: 0, kind: input, shape index: {}]   ;;  %s875_s1 = inlined_call_operand.hbm [shape: f32[2,512], index: 1, kind: input, shape index: {}]   ;;  %s876_s2 = inlined_call_operand.vmem [shape: f32[4,512], index: 2, kind: output, shape index: {0}]   ;;  %s877_s3 = inlined_call_operand.vmem [shape: f32[4,512], index: 3, kind: output, shape index: {1}]   ;;  %s878_s4 = inlined_call_operand.vmem [shape: s32[2,1], index: 4, kind: output, shape index: {2}]  }
   0x1   :  { %s18_s16 = sshll.u32 %s569_s15, 4  ;;  %s545_s19 = scalar_lea.hbm %s875_s1, 128  ;;  %s19_s16 = int_to_ptr.vmem [resolvable:$true] %s18_s16 }
   0x2   :  { %p546_p0 = scmp.ne.s32.totalorder %s875_s1, %s545_s19  ;;  %p549_p1 = scmp.lt.u32.totalorder %s545_s19, %s875_s1 }
   0x4   :  { %p551_p2 = pnand %p549_p1, %p546_p0 }
   0x6   :  { %554 = shalt.err (!%p551_p2)
}
   0x7   :  { %s555_s24 = scalar_lea.vmem %s19_s16, 128  ;;  %p560_p4 = scmp.lt.s32.totalorder %s19_s16, %s19_s16 }
   0x8   :  { %p556_p3 = scmp.ne.s32.totalorder %s19_s16, %s555_s24  ;;  %p561_p5 = scmp.lt.s32.totalorder %s555_s24, %s555_s24 }
   0xa   :  { %p562_p6 = por %p561_p5, %p560_p4 }
   0xc   :  { %p563_p7 = pnand %p562_p6, %p556_p3 }
   0xe   :  { %566 = shalt.err (!%p563_p7)
}
   0xf   :  { %21 = dma.hbm_to_vmem [thread:$0]  %s875_s1, 128, %s19_s16, [#allocation5]   ;;  %v26_v0 = vlaneseq  ;;  %v621_v1 = vstv %s874_s0 }
  0x10   :  { %567 = dma.done.wait [#allocation5], 128  }
  0x11   :  { %568 = vsyncadd [#allocation5], 4294967168  ;;  %v30_v2 = vadd.s32 %v621_v1, %v26_v0  ;;  %v28_v17 = vxor.u32 %v621_v1, %v621_v1  ;;  %v570_v25 = vmov 0   ;;  %vm151_vm0 = vcmask 1024  }
  0x12   :  { %527 = vset.pattern.permute.xlu0 %v570_v25 }
  0x13   :  { %v31_v3 = vadd.s32 %v30_v2, %v30_v2  ;;  %v32_v4 = vshll.u32 %v30_v2, 13  ;;  %v33_v5 = vshrl.u32 %v30_v2, 19  ;;  %v627_v22 = vxor.u32 466688986, %v28_v17 }
  0x15   :  { %v34_v6 = vor.u32 %v33_v5, %v32_v4 }
  0x17   :  { %v35_v7 = vxor.u32 %v34_v6, %v31_v3 }
  0x19   :  { %v36_v8 = vadd.s32 %v35_v7, %v31_v3  ;;  %v37_v9 = vshll.u32 %v35_v7, 15  ;;  %v38_v10 = vshrl.u32 %v35_v7, 17 }
  0x1b   :  { %v39_v11 = vor.u32 %v38_v10, %v37_v9 }
  0x1d   :  { %v40_v12 = vxor.u32 %v39_v11, %v36_v8 }
  0x1f   :  { %v41_v13 = vadd.s32 %v40_v12, %v36_v8  ;;  %v42_v14 = vshll.u32 %v40_v12, 26  ;;  %v43_v15 = vshrl.u32 %v40_v12, 6 }
  0x21   :  { %v44_v16 = vor.u32 %v43_v15, %v42_v14 }
  0x23   :  { %v45_v18 = vxor.u32 %v44_v16, %v41_v13 }
  0x25   :  { %v46_v19 = vadd.s32 %v45_v18, %v41_v13  ;;  %v47_v20 = vshll.u32 %v45_v18, 6  ;;  %v48_v21 = vshrl.u32 %v45_v18, 26 }
  0x27   :  { %v49_v23 = vor.u32 %v48_v21, %v47_v20  ;;  %v51_v26 = vadd.s32 %v46_v19, %v621_v1 }
  0x29   :  { %v50_v24 = vxor.u32 %v49_v23, %v46_v19 }
  0x2b   :  { %v52_v27 = vadd.s32 %v50_v24, %v627_v22 }
  0x2d   :  { %v53_v28 = vadd.s32 1, %v52_v27 }
  0x2f   :  { %v54_v29 = vadd.s32 %v53_v28, %v51_v26  ;;  %v55_v30 = vshll.u32 %v53_v28, 17  ;;  %v56_v31 = vshrl.u32 %v53_v28, 15 }
  0x31   :  { %v57_v32 = vor.u32 %v56_v31, %v55_v30 }
  0x33   :  { %v58_v33 = vxor.u32 %v57_v32, %v54_v29 }
  0x35   :  { %v59_v34 = vadd.s32 %v58_v33, %v54_v29  ;;  %v60_v35 = vshll.u32 %v58_v33, 29  ;;  %v61_v36 = vshrl.u32 %v58_v33, 3 }
  0x37   :  { %v62_v37 = vor.u32 %v61_v36, %v60_v35 }
  0x39   :  { %v63_v38 = vxor.u32 %v62_v37, %v59_v34 }
  0x3b   :  { %v64_v39 = vadd.s32 %v63_v38, %v59_v34  ;;  %v65_v40 = vshll.u32 %v63_v38, 16  ;;  %v66_v41 = vshrl.u32 %v63_v38, 16 }
  0x3d   :  { %v67_v42 = vor.u32 %v66_v41, %v65_v40 }
  0x3f   :  { %v68_v43 = vxor.u32 %v67_v42, %v64_v39 }
  0x41   :  { %v69_v44 = vadd.s32 %v68_v43, %v64_v39  ;;  %v70_v45 = vshll.u32 %v68_v43, 24  ;;  %v71_v46 = vshrl.u32 %v68_v43, 8 }
  0x43   :  { %v72_v47 = vor.u32 %v71_v46, %v70_v45  ;;  %v74_v49 = vadd.s32 %v69_v44, %v627_v22 }
  0x45   :  { %v73_v48 = vxor.u32 %v72_v47, %v69_v44 }
  0x47   :  { %v75_v50 = vadd.s32 %v73_v48, %v621_v1 }
  0x49   :  { %v76_v51 = vadd.s32 2, %v75_v50 }
  0x4b   :  { %v77_v52 = vadd.s32 %v76_v51, %v74_v49  ;;  %v78_v53 = vshll.u32 %v76_v51, 13  ;;  %v79_v54 = vshrl.u32 %v76_v51, 19 }
  0x4d   :  { %v80_v55 = vor.u32 %v79_v54, %v78_v53 }
  0x4f   :  { %v81_v56 = vxor.u32 %v80_v55, %v77_v52 }
  0x51   :  { %v82_v57 = vadd.s32 %v81_v56, %v77_v52  ;;  %v83_v58 = vshll.u32 %v81_v56, 15  ;;  %v84_v59 = vshrl.u32 %v81_v56, 17 }
  0x53   :  { %v85_v60 = vor.u32 %v84_v59, %v83_v58 }
  0x55   :  { %v86_v61 = vxor.u32 %v85_v60, %v82_v57 }
  0x57   :  { %v87_v62 = vadd.s32 %v86_v61, %v82_v57  ;;  %v88_v63 = vshll.u32 %v86_v61, 26  ;;  %v89_v2 = vshrl.u32 %v86_v61, 6 }
  0x59   :  { %v90_v3 = vor.u32 %v89_v2, %v88_v63 }
  0x5b   :  { %v91_v4 = vxor.u32 %v90_v3, %v87_v62 }
  0x5d   :  { %v92_v5 = vadd.s32 %v91_v4, %v87_v62  ;;  %v93_v6 = vshll.u32 %v91_v4, 6  ;;  %v94_v7 = vshrl.u32 %v91_v4, 26 }
  0x5f   :  { %v95_v8 = vor.u32 %v94_v7, %v93_v6  ;;  %v97_v10 = vadd.s32 %v92_v5, %v621_v1  ;;  %v639_v7 = vld [vmem:[#allocation4] sm:$0xff] }
  0x60   :  { %514 = vst.sshfl [vmem:[%s876_s2 + $0x8] sm:$0xf0 pattern:$0x76325410] %v639_v7 }
  0x61   :  { %v96_v9 = vxor.u32 %v95_v8, %v92_v5 }
  0x63   :  { %v98_v11 = vadd.s32 %v96_v9, %v621_v1 }
  0x65   :  { %v99_v12 = vadd.s32 3, %v98_v11 }
  0x67   :  { %v100_v13 = vadd.s32 %v99_v12, %v97_v10  ;;  %v101_v14 = vshll.u32 %v99_v12, 17  ;;  %v102_v15 = vshrl.u32 %v99_v12, 15 }
  0x69   :  { %v103_v16 = vor.u32 %v102_v15, %v101_v14 }
  0x6b   :  { %v104_v17 = vxor.u32 %v103_v16, %v100_v13  ;;  %v426_v16 = vcombine.low %v639_v7, %v639_v7 }
  0x6d   :  { %v105_v18 = vadd.s32 %v104_v17, %v100_v13  ;;  %v106_v19 = vshll.u32 %v104_v17, 29  ;;  %v107_v20 = vshrl.u32 %v104_v17, 3  ;;  %513 = vst.sshfl [vmem:[%s876_s2] sm:$0xf0 pattern:$0x76325410] %v426_v16 }
  0x6f   :  { %v108_v21 = vor.u32 %v107_v20, %v106_v19 }
  0x71   :  { %v109_v23 = vxor.u32 %v108_v21, %v105_v18 }
  0x73   :  { %v110_v24 = vadd.s32 %v109_v23, %v105_v18  ;;  %v111_v25 = vshll.u32 %v109_v23, 16  ;;  %v112_v26 = vshrl.u32 %v109_v23, 16 }
  0x75   :  { %v113_v27 = vor.u32 %v112_v26, %v111_v25 }
  0x77   :  { %v114_v28 = vxor.u32 %v113_v27, %v110_v24 }
  0x79   :  { %v115_v29 = vadd.s32 %v114_v28, %v110_v24  ;;  %v116_v30 = vshll.u32 %v114_v28, 24  ;;  %v117_v31 = vshrl.u32 %v114_v28, 8 }
  0x7b   :  { %v118_v32 = vor.u32 %v117_v31, %v116_v30  ;;  %v120_v34 = vadd.s32 %v115_v29, %v621_v1 }
  0x7d   :  { %v119_v33 = vxor.u32 %v118_v32, %v115_v29 }
  0x7f   :  { %v121_v35 = vadd.s32 %v119_v33, %v627_v22 }
  0x81   :  { %v122_v36 = vadd.s32 4, %v121_v35 }
  0x83   :  { %v123_v37 = vadd.s32 %v122_v36, %v120_v34  ;;  %v124_v38 = vshll.u32 %v122_v36, 13  ;;  %v125_v39 = vshrl.u32 %v122_v36, 19 }
  0x85   :  { %v126_v40 = vor.u32 %v125_v39, %v124_v38 }
  0x87   :  { %v127_v41 = vxor.u32 %v126_v40, %v123_v37 }
  0x89   :  { %v128_v42 = vadd.s32 %v127_v41, %v123_v37  ;;  %v129_v43 = vshll.u32 %v127_v41, 15  ;;  %v130_v44 = vshrl.u32 %v127_v41, 17 }
  0x8b   :  { %v131_v45 = vor.u32 %v130_v44, %v129_v43 }
  0x8d   :  { %v132_v46 = vxor.u32 %v131_v45, %v128_v42 }
  0x8f   :  { %v133_v47 = vadd.s32 %v132_v46, %v128_v42  ;;  %v134_v48 = vshll.u32 %v132_v46, 26  ;;  %v135_v49 = vshrl.u32 %v132_v46, 6 }
  0x91   :  { %v136_v50 = vor.u32 %v135_v49, %v134_v48 }
  0x93   :  { %v137_v51 = vxor.u32 %v136_v50, %v133_v47 }
  0x95   :  { %v138_v52 = vadd.s32 %v137_v51, %v133_v47  ;;  %v139_v53 = vshll.u32 %v137_v51, 6  ;;  %v140_v54 = vshrl.u32 %v137_v51, 26 }
  0x97   :  { %v141_v55 = vor.u32 %v140_v54, %v139_v53  ;;  %v143_v57 = vadd.s32 %v138_v52, %v627_v22 }
  0x99   :  { %v142_v56 = vxor.u32 %v141_v55, %v138_v52 }
  0x9b   :  { %v144_v58 = vadd.s32 %v142_v56, %v621_v1 }
  0x9d   :  { %v145_v59 = vadd.s32 5, %v144_v58 }
  0x9f   :  { %v146_v60 = vxor.u32 %v145_v59, %v143_v57 }
  0xa1   :  { %147 = set.rngseed %v146_v60 }
  0xa2   :  { %v148_v61 = vrng }
  0xa3   :  { %v149_v62 = vand.u32 15, %v148_v61  ;;  %v153_v63 = vrng }
  0xa4   :  { %v157_v2 = vshrl.u32 %v153_v63, 9  ;;  %v154_v3 = vrng }
  0xa5   :  { %v150_v4 = vadd.s32 1, %v149_v62  ;;  %v158_v5 = vshrl.u32 %v154_v3, 9  ;;  %v155_v6 = vrng }
  0xa6   :  { %v161_v8 = vor.u32 1065353216, %v157_v2  ;;  %v159_v9 = vshrl.u32 %v155_v6, 9  ;;  %v156_v10 = vrng }
  0xa7   :  { %v162_v1 = vor.u32 1065353216, %v158_v5  ;;  %152 = vst.msk [vmem:[%s878_s4] sm:$0x3] %vm151_vm0, %v150_v4  ;;  %v160_v22 = vshrl.u32 %v156_v10, 9  ;;  %v407_v11 = vmul.u32 32, %v150_v4 }
  0xa8   :  { %v501_v12 = vadd.f32 -1.0, %v161_v8  ;;  %v163_v13 = vor.u32 1065353216, %v159_v9 }
  0xa9   :  { %v502_v14 = vadd.f32 -1.0, %v162_v1  ;;  %v164_v15 = vor.u32 1065353216, %v160_v22  ;;  %409 = vperm.xlu0 %527, %v407_v11  }
  0xaa   :  { %v173_v17 = vmul.f32 2.0, %v501_v12  ;;  %v503_v18 = vadd.f32 -1.0, %v163_v13 }
  0xab   :  { %v174_v19 = vmul.f32 2.0, %v502_v14  ;;  %v504_v20 = vadd.f32 -1.0, %v164_v15 }
  0xac   :  { %v177_v21 = vadd.f32 -0.99999994, %v173_v17  ;;  %v175_v23 = vmul.f32 2.0, %v503_v18 }
  0xad   :  { %v178_v24 = vadd.f32 -0.99999994, %v174_v19  ;;  %v176_v25 = vmul.f32 2.0, %v504_v20 }
  0xae   :  { %v653_v26 = vmax.f32 %v177_v21, -0.99999994  ;;  %v179_v27 = vadd.f32 -0.99999994, %v175_v23 }
  0xaf   :  { %v655_v28 = vmax.f32 %v178_v24, -0.99999994  ;;  %v180_v29 = vadd.f32 -0.99999994, %v176_v25 }
  0xb0   :  { %v185_v30 = vsub.f32 0.0, %v653_v26  ;;  %v658_v31 = vmax.f32 %v179_v27, -0.99999994 }
  0xb1   :  { %v186_v32 = vsub.f32 0.0, %v655_v28  ;;  %v661_v33 = vmax.f32 %v180_v29, -0.99999994 }
  0xb2   :  { %v189_v34 = vmul.f32 %v185_v30, %v653_v26  ;;  %v187_v35 = vsub.f32 0.0, %v658_v31 }
  0xb3   :  { %v190_v36 = vmul.f32 %v186_v32, %v655_v28  ;;  %v188_v37 = vsub.f32 0.0, %v661_v33 }
  0xb4   :  { %v193_v38 = vadd.f32 1.0, %v189_v34  ;;  %v191_v39 = vmul.f32 %v187_v35, %v658_v31  ;;  %v196_v43 = vmul.f32 -0.5, %v189_v34  ;;  %v199_v49 = vand.u32 2147483647, %v189_v34 }
  0xb5   :  { %v202_v40 = vadd.f32 1.0, %v190_v36  ;;  %v192_v41 = vmul.f32 %v188_v37, %v661_v33  ;;  %v205_v44 = vmul.f32 -0.5, %v190_v36  ;;  %v208_v51 = vand.u32 2147483647, %v190_v36 }
  0xb6   :  { %529 = vlog2.f32 %v193_v38  ;;  %v211_v42 = vadd.f32 1.0, %v191_v39  ;;  %v214_v46 = vmul.f32 -0.5, %v191_v39  ;;  %v197_v47 = vadd.f32 1.0, %v196_v43 }
  0xb7   :  { %531 = vlog2.f32 %v202_v40  ;;  %v220_v45 = vadd.f32 1.0, %v192_v41  ;;  %v223_v48 = vmul.f32 -0.5, %v192_v41  ;;  %v206_v50 = vadd.f32 1.0, %v205_v44 }
  0xb8   :  { %533 = vlog2.f32 %v211_v42  ;;  %v215_v52 = vadd.f32 1.0, %v214_v46  ;;  %v217_v53 = vand.u32 2147483647, %v191_v39  ;;  %v198_v54 = vmul.f32 %v197_v47, %v189_v34 }
  0xb9   :  { %535 = vlog2.f32 %v220_v45  ;;  %v224_v55 = vadd.f32 1.0, %v223_v48  ;;  %vm200_vm1 = vcmp.lt.f32.partialorder %v199_v49, 0.0004427343  ;;  %v207_v57 = vmul.f32 %v206_v50, %v190_v36 }
  0xba   :  { %v226_v58 = vand.u32 2147483647, %v192_v41  ;;  %vm209_vm2 = vcmp.lt.f32.partialorder %v208_v51, 0.0004427343  ;;  %v216_v61 = vmul.f32 %v215_v52, %v191_v39  ;;  %vm218_vm3 = vcmp.lt.f32.partialorder %v217_v53, 0.0004427343 }
  0xbb   :  { %v225_v4 = vmul.f32 %v224_v55, %v192_v41  ;;  %v571_v36 = vmov -0.00020021426   ;;  %v572_v44 = vmov 0.00010095056  }
  0xbc   :  { %vm227_vm4 = vcmp.lt.f32.partialorder %v226_v58, 0.0004427343 }
  0xc0   :  { %v530_v56 = vpop.eup %529 }
  0xc1   :  { %v532_v59 = vpop.eup %531  ;;  %v195_v60 = vmul.f32 0.6931472, %v530_v56 }
  0xc2   :  { %v534_v62 = vpop.eup %533  ;;  %v204_v63 = vmul.f32 0.6931472, %v532_v59 }
  0xc3   :  { %v201_v2 = vsel %vm200_vm1, %v198_v54, %v195_v60  ;;  %v213_v3 = vmul.f32 0.6931472, %v534_v62  ;;  %v536_v5 = vpop.eup %535 }
  0xc4   :  { %v669_v6 = vsub.f32 0.0, %v201_v2  ;;  %v210_v8 = vsel %vm209_vm2, %v207_v57, %v204_v63  ;;  %v222_v1 = vmul.f32 0.6931472, %v536_v5 }
  0xc5   :  { %v671_v9 = vsub.f32 0.0, %v210_v8  ;;  %v219_v10 = vsel %vm218_vm3, %v216_v61, %v213_v3  ;;  %v573_v61 = vmov 0.0013493432  }
  0xc6   :  { %v673_v22 = vsub.f32 0.0, %v219_v10  ;;  %537 = vrsqrt.f32 %v669_v6  ;;  %v228_v11 = vsel %vm227_vm4, %v225_v4, %v222_v1  ;;  %vm233_vm5 = vcmp.lt.f32.partialorder %v669_v6, 5.0 }
  0xc7   :  { %v676_v12 = vsub.f32 0.0, %v228_v11  ;;  %539 = vrsqrt.f32 %v671_v9  ;;  %v505_v13 = vadd.f32 -2.5, %v669_v6  ;;  %vm234_vm6 = vcmp.lt.f32.partialorder %v671_v9, 5.0 }
  0xc8   :  { %541 = vrsqrt.f32 %v673_v22  ;;  %v506_v15 = vadd.f32 -2.5, %v671_v9  ;;  %vm243_vm7 = vcmp.eq.f32.partialorder %v669_v6, inf  ;;  %v246_v16 = vand.u32 2147483648, %v669_v6 }
  0xc9   :  { %543 = vrsqrt.f32 %v676_v12  ;;  %vm235_vm8 = vcmp.lt.f32.partialorder %v673_v22, 5.0  ;;  %v507_v17 = vadd.f32 -2.5, %v673_v22  ;;  %vm245_vm9 = vcmp.eq.f32.partialorder %v669_v6, 0.0 }
  0xca   :  { %vm236_vm10 = vcmp.lt.f32.partialorder %v676_v12, 5.0  ;;  %v508_v19 = vadd.f32 -2.5, %v676_v12  ;;  %vm250_vm11 = vcmp.eq.f32.partialorder %v671_v9, inf  ;;  %vm252_vm12 = vcmp.eq.f32.partialorder %v671_v9, 0.0 }
  0xcb   :  { %v253_v23 = vand.u32 2147483648, %v671_v9  ;;  %vm257_vm13 = vcmp.eq.f32.partialorder %v673_v22, inf  ;;  %vm259_vm14 = vcmp.eq.f32.partialorder %v673_v22, 0.0  ;;  %v260_v29 = vand.u32 2147483648, %v673_v22 }
  0xcc   :  { %vm264_vm15 = vcmp.eq.f32.partialorder %v676_v12, inf  ;;  %v267_v34 = vand.u32 2147483648, %v676_v12  ;;  %v277_v37 = vsel %vm233_vm5, 2.8102264e-08, %v571_v36  ;;  %vm266_vm0 = vcmp.eq.f32.partialorder %v676_v12, 0.0 }
  0xcd   :  { %v278_v40 = vsel %vm234_vm6, 2.8102264e-08, %v571_v36  ;;  %v281_v45 = vsel %vm233_vm5, 3.4327394e-07, %v572_v44  ;;  %v279_v52 = vsel %vm235_vm8, 2.8102264e-08, %v571_v36 }
  0xce   :  { %v280_v53 = vsel %vm236_vm10, 2.8102264e-08, %v571_v36  ;;  %v282_v56 = vsel %vm234_vm6, 3.4327394e-07, %v572_v44  ;;  %v283_v59 = vsel %vm235_vm8, 3.4327394e-07, %v572_v44 }
  0xcf   :  { %v293_v62 = vsel %vm233_vm5, -3.5233877e-06, %v573_v61  ;;  %v284_v2 = vsel %vm236_vm10, 3.4327394e-07, %v572_v44  ;;  %v294_v1 = vsel %vm234_vm6, -3.5233877e-06, %v573_v61 }
  0xd0   :  { %v538_v14 = vpop.eup %537 }
  0xd1   :  { %v242_v18 = vmul.f32 %v538_v14, %v669_v6  ;;  %v540_v20 = vpop.eup %539  ;;  %v295_v14 = vsel %vm235_vm8, -3.5233877e-06, %v573_v61 }
  0xd2   :  { %v542_v24 = vpop.eup %541  ;;  %v249_v27 = vmul.f32 %v540_v20, %v671_v9 }
  0xd3   :  { %v244_v21 = vsel %vm243_vm7, %v669_v6, %v242_v18  ;;  %v544_v30 = vpop.eup %543  ;;  %v256_v32 = vmul.f32 %v542_v24, %v673_v22  ;;  %v296_v18 = vsel %vm236_vm10, -3.5233877e-06, %v573_v61  ;;  %v379_v6 = vand.u32 2147483647, %v658_v31 }
  0xd4   :  { %v247_v25 = vsel %vm245_vm9, %v246_v16, %v244_v21  ;;  %v251_v38 = vsel %vm250_vm11, %v671_v9, %v249_v27  ;;  %v263_v39 = vmul.f32 %v544_v30, %v676_v12  ;;  %v574_v16 = vmov -0.0036734284  }
  0xd5   :  { %v509_v35 = vadd.f32 -3.0, %v247_v25  ;;  %v254_v41 = vsel %vm252_vm12, %v253_v23, %v251_v38  ;;  %v258_v42 = vsel %vm257_vm13, %v673_v22, %v256_v32  ;;  %v306_v25 = vsel %vm234_vm6, -4.3915065e-06, %v574_v16 }
  0xd6   :  { %v261_v46 = vsel %vm259_vm14, %v260_v29, %v258_v42  ;;  %v265_v47 = vsel %vm264_vm15, %v676_v12, %v263_v39  ;;  %v510_v48 = vadd.f32 -3.0, %v254_v41  ;;  %v307_v30 = vsel %vm235_vm8, -4.3915065e-06, %v574_v16 }
  0xd7   :  { %v720_v43 = vsel %vm233_vm5, %v505_v13, %v509_v35  ;;  %v268_v50 = vsel %vm266_vm0, %v267_v34, %v265_v47  ;;  %v511_v51 = vadd.f32 -3.0, %v261_v46  ;;  %v575_v34 = vmov 0.0057395077  }
  0xd8   :  { %v285_v49 = vmul.f32 %v277_v37, %v720_v43  ;;  %v512_v54 = vadd.f32 -3.0, %v268_v50  ;;  %v736_v55 = vsel %vm234_vm6, %v506_v15, %v510_v48  ;;  %v317_v35 = vsel %vm233_vm5, 0.00021858087, %v575_v34 }
  0xd9   :  { %v742_v58 = vsel %vm235_vm8, %v507_v17, %v511_v51  ;;  %v286_v60 = vmul.f32 %v278_v40, %v736_v55  ;;  %v305_v17 = vsel %vm233_vm5, -4.3915065e-06, %v574_v16  ;;  %v308_v36 = vsel %vm236_vm10, -4.3915065e-06, %v574_v16 }
  0xda   :  { %v289_v57 = vadd.f32 %v285_v49, %v281_v45  ;;  %v751_v63 = vsel %vm236_vm10, %v508_v19, %v512_v54  ;;  %v287_v3 = vmul.f32 %v279_v52, %v742_v58  ;;  %v318_v42 = vsel %vm234_vm6, 0.00021858087, %v575_v34 }
  0xdb   :  { %v288_v5 = vmul.f32 %v280_v53, %v751_v63  ;;  %v290_v8 = vadd.f32 %v286_v60, %v282_v56  ;;  %v319_v46 = vsel %vm235_vm8, 0.00021858087, %v575_v34  ;;  %v320_v48 = vsel %vm236_vm10, 0.00021858087, %v575_v34 }
  0xdc   :  { %v297_v4 = vmul.f32 %v289_v57, %v720_v43  ;;  %v291_v10 = vadd.f32 %v287_v3, %v283_v59  ;;  %v576_v53 = vmov -0.0076224613   ;;  %v380_v9 = vand.u32 2147483647, %v661_v33 }
  0xdd   :  { %v292_v13 = vadd.f32 %v288_v5, %v284_v2  ;;  %v298_v15 = vmul.f32 %v290_v8, %v736_v55  ;;  %v329_v54 = vsel %vm233_vm5, -0.001253725, %v576_v53  ;;  %v330_v61 = vsel %vm234_vm6, -0.001253725, %v576_v53 }
  0xde   :  { %v301_v11 = vadd.f32 %v297_v4, %v293_v62  ;;  %v299_v19 = vmul.f32 %v291_v10, %v742_v58  ;;  %v331_v3 = vsel %vm235_vm8, -0.001253725, %v576_v53  ;;  %v577_v8 = vmov 0.0094388705  }
  0xdf   :  { %v300_v21 = vmul.f32 %v292_v13, %v751_v63  ;;  %v302_v23 = vadd.f32 %v298_v15, %v294_v1  ;;  %v341_v10 = vsel %vm233_vm5, -0.0041776816, %v577_v8  ;;  %v332_v1 = vsel %vm236_vm10, -0.001253725, %v576_v53 }
  0xe0   :  { %v309_v20 = vmul.f32 %v301_v11, %v720_v43  ;;  %v303_v24 = vadd.f32 %v299_v19, %v295_v14  ;;  %v342_v16 = vsel %vm234_vm6, -0.0041776816, %v577_v8  ;;  %v343_v19 = vsel %vm235_vm8, -0.0041776816, %v577_v8 }
  0xe1   :  { %v304_v29 = vadd.f32 %v300_v21, %v296_v18  ;;  %v310_v32 = vmul.f32 %v302_v23, %v736_v55  ;;  %v578_v23 = vmov 1.001674   ;;  %vm383_vm3 = vcmp.eq.f32.partialorder %v379_v6, 1.0 }
  0xe2   :  { %v313_v27 = vadd.f32 %v309_v20, %v305_v17  ;;  %v311_v37 = vmul.f32 %v303_v24, %v742_v58  ;;  %v353_v24 = vsel %vm233_vm5, 0.24664073, %v578_v23  ;;  %v354_v34 = vsel %vm234_vm6, 0.24664073, %v578_v23 }
  0xe3   :  { %v312_v39 = vmul.f32 %v304_v29, %v751_v63  ;;  %v314_v40 = vadd.f32 %v310_v32, %v306_v25  ;;  %v344_v25 = vsel %vm236_vm10, -0.0041776816, %v577_v8  ;;  %vm384_vm4 = vcmp.eq.f32.partialorder %v380_v9, 1.0 }
  0xe4   :  { %v321_v38 = vmul.f32 %v313_v27, %v720_v43  ;;  %v315_v41 = vadd.f32 %v311_v37, %v307_v30  ;;  %v377_v37 = vand.u32 2147483647, %v653_v26 }
  0xe5   :  { %v316_v45 = vadd.f32 %v312_v39, %v308_v36  ;;  %v322_v47 = vmul.f32 %v314_v40, %v736_v55 }
  0xe6   :  { %v325_v44 = vadd.f32 %v321_v38, %v317_v35  ;;  %v323_v49 = vmul.f32 %v315_v41, %v742_v58  ;;  %v355_v38 = vsel %vm235_vm8, 0.24664073, %v578_v23  ;;  %v579_v41 = vmov 2.8329768  }
  0xe7   :  { %v324_v51 = vmul.f32 %v316_v45, %v751_v63  ;;  %v326_v52 = vadd.f32 %v322_v47, %v318_v42  ;;  %v365_v42 = vsel %vm233_vm5, 1.5014094, %v579_v41  ;;  %v367_v53 = vsel %vm235_vm8, 1.5014094, %v579_v41 }
  0xe8   :  { %v333_v50 = vmul.f32 %v325_v44, %v720_v43  ;;  %v327_v56 = vadd.f32 %v323_v49, %v319_v46  ;;  %v356_v44 = vsel %vm236_vm10, 0.24664073, %v578_v23  ;;  %v385_v49 = vmul.f32 inf, %v653_v26 }
  0xe9   :  { %v328_v59 = vadd.f32 %v324_v51, %v320_v48  ;;  %v334_v60 = vmul.f32 %v326_v52, %v736_v55  ;;  %v378_v48 = vand.u32 2147483647, %v655_v28  ;;  %vm381_vm1 = vcmp.eq.f32.partialorder %v377_v37, 1.0 }
  0xea   :  { %v337_v57 = vadd.f32 %v333_v50, %v329_v54  ;;  %v335_v62 = vmul.f32 %v327_v56, %v742_v58  ;;  %v366_v50 = vsel %vm234_vm6, 1.5014094, %v579_v41 }
  0xeb   :  { %v336_v4 = vmul.f32 %v328_v59, %v751_v63  ;;  %v338_v5 = vadd.f32 %v334_v60, %v330_v61  ;;  %vm382_vm2 = vcmp.eq.f32.partialorder %v378_v48, 1.0 }
  0xec   :  { %v345_v2 = vmul.f32 %v337_v57, %v720_v43  ;;  %v339_v11 = vadd.f32 %v335_v62, %v331_v3  ;;  %v388_v62 = vmul.f32 inf, %v661_v33 }
  0xed   :  { %v340_v14 = vadd.f32 %v336_v4, %v332_v1  ;;  %v346_v15 = vmul.f32 %v338_v5, %v736_v55 }
  0xee   :  { %v349_v13 = vadd.f32 %v345_v2, %v341_v10  ;;  %v347_v17 = vmul.f32 %v339_v11, %v742_v58 }
  0xef   :  { %v348_v20 = vmul.f32 %v340_v14, %v751_v63  ;;  %v350_v21 = vadd.f32 %v346_v15, %v342_v16  ;;  %v459_v15 = vcombine.high %v639_v7, %v639_v7  ;;  %v403_v16 = vand.u32 127, %v26_v0 }
  0xf0   :  { %v357_v18 = vmul.f32 %v349_v13, %v720_v43  ;;  %v351_v27 = vadd.f32 %v347_v17, %v343_v19  ;;  %v438_v13 = vshrl.u32 %v26_v0, 7 }
  0xf1   :  { %v352_v30 = vadd.f32 %v348_v20, %v344_v25  ;;  %v358_v32 = vmul.f32 %v350_v21, %v736_v55  ;;  %v404_v19 = vadd.s32 128, %v403_v16  ;;  %v405_v20 = vadd.s32 256, %v403_v16 }
  0xf2   :  { %v361_v29 = vadd.f32 %v357_v18, %v353_v24  ;;  %v359_v35 = vmul.f32 %v351_v27, %v742_v58  ;;  %v406_v21 = vadd.s32 384, %v403_v16 }
  0xf3   :  { %v360_v39 = vmul.f32 %v352_v30, %v751_v63  ;;  %v362_v40 = vadd.f32 %v358_v32, %v354_v34 }
  0xf4   :  { %v369_v36 = vmul.f32 %v361_v29, %v720_v43  ;;  %v363_v45 = vadd.f32 %v359_v35, %v355_v38 }
  0xf5   :  { %v364_v47 = vadd.f32 %v360_v39, %v356_v44  ;;  %v370_v43 = vmul.f32 %v362_v40, %v736_v55  ;;  %v368_v55 = vsel %vm236_vm10, 1.5014094, %v579_v41 }
  0xf6   :  { %v373_v46 = vadd.f32 %v369_v36, %v365_v42  ;;  %v371_v51 = vmul.f32 %v363_v45, %v742_v58  ;;  %v386_v58 = vmul.f32 inf, %v655_v28 }
  0xf7   :  { %v372_v54 = vmul.f32 %v364_v47, %v751_v63  ;;  %v374_v56 = vadd.f32 %v370_v43, %v366_v50 }
  0xf8   :  { %v389_v52 = vmul.f32 %v373_v46, %v653_v26  ;;  %v375_v57 = vadd.f32 %v371_v51, %v367_v53  ;;  %v387_v26 = vmul.f32 inf, %v658_v31 }
  0xf9   :  { %v376_v60 = vadd.f32 %v372_v54, %v368_v55  ;;  %v390_v61 = vmul.f32 %v374_v56, %v655_v28 }
  0xfa   :  { %v393_v59 = vsel %vm381_vm1, %v385_v49, %v389_v52  ;;  %v391_v22 = vmul.f32 %v375_v57, %v658_v31  ;;  %v580_v31 = vmov 1983009808  }
  0xfb   :  { %v397_v63 = vmul.f32 1.4142135, %v393_v59  ;;  %v392_v12 = vmul.f32 %v376_v60, %v661_v33  ;;  %v394_v2 = vsel %vm382_vm2, %v386_v58, %v390_v61  ;;  %v435_v11 = vunpack.c.l.s4 %v580_v31 }
  0xfc   :  { %v395_v3 = vsel %vm383_vm3, %v387_v26, %v391_v22  ;;  %v398_v4 = vmul.f32 1.4142135, %v394_v2 }
  0xfd   :  { %v396_v5 = vsel %vm384_vm4, %v388_v62, %v392_v12  ;;  %v399_v8 = vmul.f32 1.4142135, %v395_v3  ;;  %v436_v33 = vunpack.c.0.s8 %v435_v11 }
  0xfe   :  { %v400_v10 = vmul.f32 1.4142135, %v396_v5  ;;  %v419_v1 = vcombine.low %v397_v63, %v398_v4 }
  0xff   :  { %v439_v14 = vsub.s32 %v436_v33, %v438_v13 }
 0x100   :  { %v420_v28 = vcombine.low %v399_v8, %v400_v10  ;;  %423 = vst [vmem:[%s876_s2] sm:$0x33] %v419_v1 }
 0x101   :  { %v440_v17 = vrot.slane %v639_v7, %v439_v14  ;;  %v466_v18 = vrot.slane %v459_v15, %v439_v14 }
 0x102   :  { %424 = vst [vmem:[%s876_s2 + $0x8] sm:$0x33] %v420_v28 }
 0x103   :  { %v467_v23 = vcombine.high %v440_v17, %v440_v17  ;;  %v468_v25 = vcombine.high %v466_v18, %v466_v18 }
 0x128   :  { %v410_v24 = vpop.permute.xlu0 %409 }
 0x129   :  { %vm411_vm5 = vcmp.lt.s32.totalorder %v403_v16, %v410_v24  ;;  %vm412_vm6 = vcmp.lt.s32.totalorder %v404_v19, %v410_v24  ;;  %vm413_vm7 = vcmp.lt.s32.totalorder %v405_v20, %v410_v24  ;;  %vm414_vm8 = vcmp.lt.s32.totalorder %v406_v21, %v410_v24 }
 0x12a   :  { %v445_v27 = vsel %vm411_vm5, %v397_v63, 0.0  ;;  %v446_v29 = vsel %vm412_vm6, %v398_v4, 0.0  ;;  %v447_v30 = vsel %vm413_vm7, %v399_v8, 0.0  ;;  %v448_v32 = vsel %vm414_vm8, %v400_v10, 0.0 }
 0x12b   :  { %v453_v34 = vcombine.low %v445_v27, %v446_v29  ;;  %v454_v35 = vcombine.low %v447_v30, %v448_v32  ;;  %v472_v0 = vsel %vm411_vm5, %v440_v17, 0.0  ;;  %v473_v36 = vsel %vm412_vm6, %v467_v23, 0.0 }
 0x12c   :  { %v474_v7 = vsel %vm413_vm7, %v466_v18, 0.0  ;;  %v475_v37 = vsel %vm414_vm8, %v468_v25, 0.0  ;;  %v480_v38 = vcombine.low %v472_v0, %v473_v36 }
 0x12d   :  { %457 = vst [vmem:[%s877_s3] sm:$0x33] %v453_v34  ;;  %458 = vst [vmem:[%s877_s3 + $0x8] sm:$0x33] %v454_v35  ;;  %v481_v39 = vcombine.low %v474_v7, %v475_v37 }
 0x12e   :  { %v482_v40 = vrot.slane %v480_v38, 6 }
 0x12f   :  { %v483_v41 = vrot.slane %v481_v39, 6 }
 0x130   :  { %486 = vst [vmem:[%s877_s3] sm:$0xcc] %v482_v40 }
 0x131   :  { %487 = vst [vmem:[%s877_s3 + $0x8] sm:$0xcc] %v483_v41 }
 0x132   :  { %500 = vsyncpa [#allocation5], 1 }

// kernel: _run_root_ext.1
= control target key start
LH: loop header
LB: loop body
LE: loop exit
PB: predicated region body
PF: predicated region fallthrough
CT: control target
= control target key end

     0   :  { %s326_s0 = inlined_call_operand.hbm [shape: s32[2], index: 0, kind: input, shape index: {}]   ;;  %s327_s1 = inlined_call_operand.hbm [shape: f32[2,512], index: 1, kind: input, shape index: {}]   ;;  %s328_s2 = inlined_call_operand.hbm [shape: f32[2,512], index: 2, kind: input, shape index: {}]   ;;  %s329_s3 = inlined_call_operand.vmem [shape: f32[4,512], index: 3, kind: output, shape index: {0}]   ;;  %s330_s4 = inlined_call_operand.vmem [shape: f32[4,512], index: 4, kind: output, shape index: {1}]  }
   0x1   :  { %s174_s17 = scalar_lea.hbm %s326_s0, 16 }
   0x2   :  { %p175_p0 = scmp.ne.s32.totalorder %s326_s0, %s174_s17  ;;  %p178_p1 = scmp.lt.u32.totalorder %s174_s17, %s326_s0 }
   0x4   :  { %p180_p2 = pnand %p178_p1, %p175_p0 }
   0x6   :  { %183 = shalt.err (!%p180_p2)  }
   0x7   :  { %s234_s22 = smov [#allocation3]  }
   0x8   :  { %11 = dma.hbm_to_smem %s326_s0, 16, %s234_s22, [#allocation2] }
   0x9   :  { %228 = dma.done.wait [#allocation2], 16 }
   0xa   :  { %229 = vsyncadd [#allocation2], 4294967280 }
   0xb   :  { %13 = sfence }
   0xc   :  { %14 = vsyncpa [#allocation5], 0 }
   0xd   :  { %15 = vsyncpa [#allocation7], 0  ;;  %s235_s25 = smov [#allocation4]   ;;  %s236_s27 = smov [#allocation6]  }
   0xe   :  { %s22_s26 = sshll.u32 %s235_s25, 4  ;;  %s32_s28 = sshll.u32 %s236_s27, 4  ;;  %s23_s26 = int_to_ptr.vmem [resolvable:$true] %s22_s26  ;;  %s33_s28 = int_to_ptr.vmem [resolvable:$true] %s32_s28 }
   0xf   :  { %s184_s5 = scalar_lea.hbm %s327_s1, 128 }
  0x10   :  { %p185_p3 = scmp.ne.s32.totalorder %s327_s1, %s184_s5  ;;  %p188_p4 = scmp.lt.u32.totalorder %s184_s5, %s327_s1 }
  0x12   :  { %p190_p5 = pnand %p188_p4, %p185_p3 }
  0x14   :  { %193 = shalt.err (!%p190_p5)
}
  0x15   :  { %s194_s9 = scalar_lea.vmem %s23_s26, 128  ;;  %p199_p7 = scmp.lt.s32.totalorder %s23_s26, %s23_s26 }
  0x16   :  { %p195_p6 = scmp.ne.s32.totalorder %s23_s26, %s194_s9  ;;  %p200_p8 = scmp.lt.s32.totalorder %s194_s9, %s194_s9 }
  0x18   :  { %p201_p9 = por %p200_p8, %p199_p7 }
  0x1a   :  { %p202_p10 = pnand %p201_p9, %p195_p6 }
  0x1c   :  { %205 = shalt.err (!%p202_p10)
}
  0x1d   :  { %25 = dma.hbm_to_vmem [thread:$0]  %s327_s1, 128, %s23_s26, [#allocation5]  }
  0x1e   :  { %s206_s14 = scalar_lea.hbm %s328_s2, 128 }
  0x1f   :  { %p207_p11 = scmp.ne.s32.totalorder %s328_s2, %s206_s14  ;;  %p210_p12 = scmp.lt.u32.totalorder %s206_s14, %s328_s2 }
  0x21   :  { %p212_p13 = pnand %p210_p12, %p207_p11 }
  0x23   :  { %215 = shalt.err (!%p212_p13)
}
  0x24   :  { %s216_s19 = scalar_lea.vmem %s33_s28, 128  ;;  %p221_p1 = scmp.lt.s32.totalorder %s33_s28, %s33_s28 }
  0x25   :  { %p217_p0 = scmp.ne.s32.totalorder %s33_s28, %s216_s19  ;;  %p222_p2 = scmp.lt.s32.totalorder %s216_s19, %s216_s19 }
  0x27   :  { %p223_p3 = por %p222_p2, %p221_p1 }
  0x29   :  { %p224_p4 = pnand %p223_p3, %p217_p0 }
  0x2b   :  { %227 = shalt.err (!%p224_p4)
}
  0x2c   :  { %35 = dma.hbm_to_vmem [thread:$0]  %s328_s2, 128, %s33_s28, [#allocation7]  }
  0x2d   :  { %230 = dma.done.wait [#allocation5], 128  }
  0x2e   :  { %231 = vsyncadd [#allocation5], 4294967168 }
  0x2f   :  { %232 = dma.done.wait [#allocation7], 128  }
  0x30   :  { %233 = vsyncadd [#allocation7], 4294967168  ;;  %v42_v0 = vlaneseq  ;;  %v237_v1 = vmov 1983009808   ;;  %s50_s21 = sld [smem:[#allocation3]]  ;;  %s163_s22 = sld [smem:[#allocation3 + $0x1]] }
  0x31   :  { %v68_v2 = vunpack.c.l.s4 %v237_v1  ;;  %v63_v8 = vld [vmem:[#allocation4] sm:$0xff]  ;;  %v64_v9 = vld [vmem:[#allocation6] sm:$0xff] }
  0x32   :  { %v48_v3 = vshrl.u32 %v42_v0, 7  ;;  %v43_v4 = vand.u32 127, %v42_v0  ;;  %165 = vst.sshfl [vmem:[%s329_s3] sm:$0xf pattern:$0x76325410] %v63_v8  ;;  %v66_v13 = vcombine.high %v63_v8, %v63_v8  ;;  %v86_v14 = vcombine.low %v64_v9, %v64_v9 }
  0x33   :  { %v69_v5 = vunpack.c.0.s8 %v68_v2  ;;  %168 = vst.sshfl [vmem:[%s329_s3 + $0x8] sm:$0xf0 pattern:$0x76325410] %v64_v9  ;;  %v123_v19 = vcombine.high %v64_v9, %v64_v9 }
  0x34   :  { %v44_v7 = vadd.s32 128, %v43_v4  ;;  %vm49_vm0 = vcmp.eq.s32.totalorder %v48_v3, 0  ;;  %vm54_vm1 = vcmp.eq.s32.totalorder %v48_v3, 1  ;;  %v45_v10 = vadd.s32 256, %v43_v4 }
  0x35   :  { %v72_v6 = vsub.s32 %v69_v5, %v48_v3  ;;  %v46_v11 = vadd.s32 384, %v43_v4  ;;  %166 = vst.sshfl [vmem:[%s329_s3 + $0x8] sm:$0xf pattern:$0x76325410] %v66_v13 }
  0x36   :  { %s162_s23 = sshll.u32 %s50_s21, 5  ;;  %s164_s2 = sshll.u32 %s163_s22, 5  ;;  %167 = vst.sshfl [vmem:[%s329_s3] sm:$0xf0 pattern:$0x76325410] %v86_v14 }
  0x37   :  { %v73_v12 = vrot.slane %v63_v8, %v72_v6  ;;  %v52_v15 = vstv %s162_s23  ;;  %v57_v17 = vstv %s164_s2  ;;  %v100_v18 = vrot.slane %v64_v9, %v72_v6 }
  0x38   :  { %v53_v16 = vsel %vm49_vm0, %v52_v15, 0  ;;  %v80_v20 = vrot.slane %v66_v13, %v72_v6  ;;  %v130_v30 = vrot.slane %v123_v19, %v72_v6 }
  0x39   :  { %v58_v21 = vsel %vm54_vm1, %v57_v17, %v53_v16  ;;  %v105_v22 = vcombine.high %v73_v12, %v73_v12  ;;  %v131_v28 = vcombine.high %v100_v18, %v100_v18 }
  0x3a   :  { %vm59_vm2 = vcmp.lt.s32.totalorder %v43_v4, %v58_v21  ;;  %vm60_vm3 = vcmp.lt.s32.totalorder %v44_v7, %v58_v21  ;;  %vm61_vm4 = vcmp.lt.s32.totalorder %v45_v10, %v58_v21  ;;  %vm62_vm5 = vcmp.lt.s32.totalorder %v46_v11, %v58_v21 }
  0x3b   :  { %v109_v23 = vsel %vm59_vm2, %v73_v12, 0.0  ;;  %v110_v24 = vsel %vm60_vm3, %v105_v22, 0.0  ;;  %v106_v25 = vcombine.high %v80_v20, %v80_v20  ;;  %v111_v26 = vsel %vm61_vm4, %v80_v20, 0.0 }
  0x3c   :  { %v117_v27 = vcombine.low %v109_v23, %v110_v24  ;;  %v136_v29 = vsel %vm59_vm2, %v100_v18, 0.0  ;;  %v137_v33 = vsel %vm60_vm3, %v131_v28, 0.0  ;;  %v132_v34 = vcombine.high %v130_v30, %v130_v30 }
  0x3d   :  { %v112_v31 = vsel %vm62_vm5, %v106_v25, 0.0  ;;  %v138_v35 = vsel %vm61_vm4, %v130_v30, 0.0  ;;  %v144_v36 = vcombine.low %v136_v29, %v137_v33 }
  0x3e   :  { %121 = vst [vmem:[%s330_s4] sm:$0x33] %v117_v27  ;;  %v118_v32 = vcombine.low %v111_v26, %v112_v31  ;;  %v139_v37 = vsel %vm62_vm5, %v132_v34, 0.0 }
  0x3f   :  { %v146_v38 = vrot.slane %v144_v36, 6  ;;  %v145_v39 = vcombine.low %v138_v35, %v139_v37 }
  0x40   :  { %122 = vst [vmem:[%s330_s4 + $0x8] sm:$0x33] %v118_v32 }
  0x41   :  { %150 = vst [vmem:[%s330_s4] sm:$0xcc] %v146_v38  ;;  %v147_v40 = vrot.slane %v145_v39, 6 }
  0x43   :  { %151 = vst [vmem:[%s330_s4 + $0x8] sm:$0xcc] %v147_v40 }
  0x44   :  { %160 = vsyncpa [#allocation5], 1 }
  0x45   :  { %161 = vsyncpa [#allocation7], 1 }

</bundles_post_ra>
